<compile_context>
chip_gen: v6e
topology: v6e:2x2x1
jax: 0.10.0
libtpu: 0.0.40
codegen_flags: <defaults>
</compile_context>

<pallas_src>
import jax
import jax.numpy as jnp
from jax.experimental import pallas as pl
from jax.experimental.pallas import tpu as pltpu

LANE = 128


# ----------------------------------------------------------------------------
# small helpers
# ----------------------------------------------------------------------------
def _round_up(x, m):
    return ((x + m - 1) // m) * m


def _pad_axis(a, axis, target):
    pad = target - a.shape[axis]
    if pad <= 0:
        return a
    widths = [(0, 0)] * a.ndim
    widths[axis] = (0, pad)
    return jnp.pad(a, widths)


def _const_spec(shape):
    return pl.BlockSpec(shape, lambda *_: (0,) * len(shape))


# ----------------------------------------------------------------------------
# Pallas kernels
# ----------------------------------------------------------------------------
def _pointwise_mlp_kernel(x_ref, w_ref, sc_ref, sh_ref, o_ref):
    # 1x1 conv (matmul over channels) + folded BN + ReLU
    y = jnp.dot(x_ref[...], w_ref[...], preferred_element_type=jnp.float32)
    o_ref[...] = jnp.maximum(y * sc_ref[...] + sh_ref[...], 0.0)


def _out_residual_kernel(x_ref, res_ref, w_ref, sc_ref, sh_ref, o_ref):
    # mlp_out (1x1 conv + BN + ReLU) + residual add + LeakyReLU(0.01)
    y = jnp.dot(x_ref[...], w_ref[...], preferred_element_type=jnp.float32)
    y = jnp.maximum(y * sc_ref[...] + sh_ref[...], 0.0) + res_ref[...]
    o_ref[...] = jnp.where(y >= 0.0, y, 0.01 * y)


def _lse_pool_kernel(cxyz_ref, fc_ref,
                     w_lse_ref, sc_lse_ref, sh_lse_ref,
                     w_aa_ref, w_ab_ref, w_ba_ref, w_bb_ref, b_a_ref, b_b_ref,
                     w_pa_ref, w_pb_ref, sc_pool_ref, sh_pool_ref,
                     o_ref):
    # Fused LocalSpatialEncoding MLP + AttentivePooling (+ its MLP), computed
    # per concat-half so the [tn, K, 2*Ch] concat is never materialised.
    tn, K, T = cxyz_ref.shape
    Ch = fc_ref.shape[-1]

    # LSE MLP: 10 -> Ch  (conv1x1 + folded BN + ReLU)
    x2 = cxyz_ref[...].reshape(tn * K, T)
    lse = jnp.dot(x2, w_lse_ref[...], preferred_element_type=jnp.float32)
    lse = jnp.maximum(lse * sc_lse_ref[...] + sh_lse_ref[...], 0.0)   # [tn*K, Ch]

    fc = fc_ref[...]                                                  # [tn, Ch]

    # attention logits of concat([lse, fc_broadcast]); fc-driven part needs
    # only tn rows (K-fold FLOP saving on that half)
    fc_a = jnp.dot(fc, w_ba_ref[...], preferred_element_type=jnp.float32) + b_a_ref[...]
    fc_b = jnp.dot(fc, w_bb_ref[...], preferred_element_type=jnp.float32) + b_b_ref[...]
    log_a = jnp.dot(lse, w_aa_ref[...],
                    preferred_element_type=jnp.float32).reshape(tn, K, Ch) + fc_a[:, None, :]
    log_b = jnp.dot(lse, w_ab_ref[...],
                    preferred_element_type=jnp.float32).reshape(tn, K, Ch) + fc_b[:, None, :]

    def softmax_k(lg):                          # softmax over K, per channel
        m = jnp.max(lg, axis=1, keepdims=True)
        e = jnp.exp(lg - m)
        return e * pl.reciprocal(jnp.sum(e, axis=1, keepdims=True), approx=True)

    s_a = softmax_k(log_a)                      # scores for the lse half
    s_b = softmax_k(log_b)                      # scores for the fc  half

    lse3 = lse.reshape(tn, K, Ch)
    agg_a = jnp.sum(s_a * lse3, axis=1)         # [tn, Ch]
    agg_b = fc * jnp.sum(s_b, axis=1)           # [tn, Ch] (fc constant over K)

    # pooling MLP: 2*Ch -> Cout, fed as the two halves (conv1x1 + BN + ReLU)
    y = (jnp.dot(agg_a, w_pa_ref[...], preferred_element_type=jnp.float32)
         + jnp.dot(agg_b, w_pb_ref[...], preferred_element_type=jnp.float32))
    o_ref[...] = jnp.maximum(y * sc_pool_ref[...] + sh_pool_ref[...], 0.0)


# ----------------------------------------------------------------------------
# pallas_call wrappers (pad ragged rows, big tiles, lane-dense channels)
# ----------------------------------------------------------------------------
def pointwise_mlp(x, w, sc, sh, tm_max=512):
    M, Cin = x.shape
    Cout = w.shape[1]
    tm = min(tm_max, _round_up(M, 8))
    Mp = _round_up(M, tm)
    xp = _pad_axis(x, 0, Mp)
    out = pl.pallas_call(
        _pointwise_mlp_kernel,
        out_shape=jax.ShapeDtypeStruct((Mp, Cout), jnp.float32),
        grid=(Mp // tm,),
        in_specs=[pl.BlockSpec((tm, Cin), lambda i: (i, 0)),
                  _const_spec((Cin, Cout)),
                  _const_spec((1, Cout)),
                  _const_spec((1, Cout))],
        out_specs=pl.BlockSpec((tm, Cout), lambda i: (i, 0)),
        compiler_params=pltpu.CompilerParams(
            dimension_semantics=("parallel",)),
    )(xp, w, sc, sh)
    return out[:M]


def out_residual(x, res, w, sc, sh, tm_max=512):
    M, Cin = x.shape
    Cout = w.shape[1]
    tm = min(tm_max, _round_up(M, 8))
    Mp = _round_up(M, tm)
    xp = _pad_axis(x, 0, Mp)
    rp = _pad_axis(res, 0, Mp)
    out = pl.pallas_call(
        _out_residual_kernel,
        out_shape=jax.ShapeDtypeStruct((Mp, Cout), jnp.float32),
        grid=(Mp // tm,),
        in_specs=[pl.BlockSpec((tm, Cin), lambda i: (i, 0)),
                  pl.BlockSpec((tm, Cout), lambda i: (i, 0)),
                  _const_spec((Cin, Cout)),
                  _const_spec((1, Cout)),
                  _const_spec((1, Cout))],
        out_specs=pl.BlockSpec((tm, Cout), lambda i: (i, 0)),
        compiler_params=pltpu.CompilerParams(
            dimension_semantics=("parallel",)),
    )(xp, rp, w, sc, sh)
    return out[:M]


def lse_pool(cxyz, fc, p_lse, p_att, p_pool, tn_max=128):
    """cxyz: [BN, K, 10], fc: [BN, Ch] (lane-padded) -> [BN, Cout]."""
    M, K, T = cxyz.shape
    Ch = fc.shape[1]
    w_lse, sc_lse, sh_lse = p_lse
    w_aa, w_ab, w_ba, w_bb, b_a, b_b = p_att
    w_pa, w_pb, sc_p, sh_p = p_pool
    Cout = w_pa.shape[1]

    tn = min(tn_max, _round_up(M, 8))
    Mp = _round_up(M, tn)
    cxyz_p = _pad_axis(cxyz, 0, Mp)
    fc_p = _pad_axis(fc, 0, Mp)

    out = pl.pallas_call(
        _lse_pool_kernel,
        out_shape=jax.ShapeDtypeStruct((Mp, Cout), jnp.float32),
        grid=(Mp // tn,),
        in_specs=[
            pl.BlockSpec((tn, K, T), lambda i: (i, 0, 0)),
            pl.BlockSpec((tn, Ch), lambda i: (i, 0)),
            _const_spec((T, Ch)), _const_spec((1, Ch)), _const_spec((1, Ch)),
            _const_spec((Ch, Ch)), _const_spec((Ch, Ch)),
            _const_spec((Ch, Ch)), _const_spec((Ch, Ch)),
            _const_spec((1, Ch)), _const_spec((1, Ch)),
            _const_spec((Ch, Cout)), _const_spec((Ch, Cout)),
            _const_spec((1, Cout)), _const_spec((1, Cout)),
        ],
        out_specs=pl.BlockSpec((tn, Cout), lambda i: (i, 0)),
        compiler_params=pltpu.CompilerParams(
            dimension_semantics=("parallel",)),
    )(cxyz_p, fc_p, w_lse, sc_lse, sh_lse,
      w_aa, w_ab, w_ba, w_bb, b_a, b_b, w_pa, w_pb, sc_p, sh_p)
    return out[:M]


# ----------------------------------------------------------------------------
# Parameters (deterministic synthetic init; BN folded in eval mode)
# ----------------------------------------------------------------------------
def make_mlp_params(key, cin, cout, eps=1e-5):
    kw, kb, kg, kbe = jax.random.split(key, 4)
    w = 0.1 * jax.random.normal(kw, (cin, cout), jnp.float32)
    b = 0.1 * jax.random.normal(kb, (cout,), jnp.float32)
    gamma = 1.0 + 0.1 * jax.random.normal(kg, (cout,), jnp.float32)
    beta = 0.1 * jax.random.normal(kbe, (cout,), jnp.float32)
    running_mean = jnp.zeros((cout,), jnp.float32)
    running_var = jnp.ones((cout,), jnp.float32)
    scale = gamma / jnp.sqrt(running_var + eps)
    shift = (b - running_mean) * scale + beta
    return w, scale.reshape(1, cout), shift.reshape(1, cout)


def make_linear_params(key, c):
    kw, kb = jax.random.split(key, 2)
    w = 0.1 * jax.random.normal(kw, (c, c), jnp.float32)   # [in, out]
    b = 0.1 * jax.random.normal(kb, (1, c), jnp.float32)
    return w, b


def init_params(key, d_in, d_out):
    d_half = d_out // 2
    ks = jax.random.split(key, 9)
    return {
        "shortcut": make_mlp_params(ks[0], d_in, 2 * d_out),
        "mlp_in":   make_mlp_params(ks[1], d_in, d_half),
        "mlp_out":  make_mlp_params(ks[2], d_out, 2 * d_out),
        "lse1":     make_mlp_params(ks[3], 10, d_half),
        "lse2":     make_mlp_params(ks[4], 10, d_half),
        "att1":     make_linear_params(ks[5], d_out),
        "att2":     make_linear_params(ks[6], d_out),
        "pool1":    make_mlp_params(ks[7], d_out, d_half),
        "pool2":    make_mlp_params(ks[8], d_out, d_out),
    }


def prepare_params(params, d_in, d_out, lane=LANE):
    """Zero-pad channels to lane multiples, split attention/pool weights per
    concat-half, and fuse shortcut+mlp_in weights (they read the same x)."""
    d_half = d_out // 2
    d_in_p = _round_up(d_in, lane)
    d_half_p = _round_up(d_half, lane)
    d_out_p = _round_up(d_out, lane)
    c2_p = _round_up(2 * d_out, lane)

    def pad_mlp(p, cin_p, cout_p):
        w, sc, sh = p
        w = _pad_axis(_pad_axis(w, 0, cin_p), 1, cout_p)
        return w, _pad_axis(sc, 1, cout_p), _pad_axis(sh, 1, cout_p)

    def split_pad_att(p, ch, ch_p):
        w, b = p
        pad2 = lambda m: _pad_axis(_pad_axis(m, 0, ch_p), 1, ch_p)
        return (pad2(w[:ch, :ch]), pad2(w[:ch, ch:]),
                pad2(w[ch:, :ch]), pad2(w[ch:, ch:]),
                _pad_axis(b[:, :ch], 1, ch_p), _pad_axis(b[:, ch:], 1, ch_p))

    def split_pad_pool(p, ch, ch_p, cout_p):
        w, sc, sh = p
        w_a = _pad_axis(_pad_axis(w[:ch], 0, ch_p), 1, cout_p)
        w_b = _pad_axis(_pad_axis(w[ch:], 0, ch_p), 1, cout_p)
        return w_a, w_b, _pad_axis(sc, 1, cout_p), _pad_axis(sh, 1, cout_p)

    shortcut = pad_mlp(params["shortcut"], d_in_p, c2_p)
    mlp_in = pad_mlp(params["mlp_in"], d_in_p, d_half_p)
    in_fused = tuple(jnp.concatenate([a, b], axis=1)
                     for a, b in zip(shortcut, mlp_in))

    return {
        "dims": {"d_in_p": d_in_p, "c2_p": c2_p, "d_out": d_out},
        "in_fused": in_fused,
        "mlp_out": pad_mlp(params["mlp_out"], d_out_p, c2_p),
        "lse1": pad_mlp(params["lse1"], 10, d_half_p),
        "lse2": pad_mlp(params["lse2"], 10, d_half_p),
        "att1": split_pad_att(params["att1"], d_half, d_half_p),
        "att2": split_pad_att(params["att2"], d_half, d_half_p),
        "pool1": split_pad_pool(params["pool1"], d_half, d_half_p, d_half_p),
        "pool2": split_pad_pool(params["pool2"], d_half, d_half_p, d_out_p),
    }


# ----------------------------------------------------------------------------
# Glue: KNN + gather (plain JAX), then the fused Pallas kernels
# ----------------------------------------------------------------------------
def knn(xyz, k):
    d2 = jnp.sum((xyz[:, :, None, :] - xyz[:, None, :, :]) ** 2, axis=-1)
    neg, idx = jax.lax.top_k(-d2, k)
    return idx.astype(jnp.int32), -neg


def build_concat_xyz(xyz, idx, dist2):
    B, N, _ = xyz.shape
    K = idx.shape[-1]
    center = jnp.broadcast_to(xyz[:, :, None, :], (B, N, K, 3))
    neigh = jax.vmap(lambda pts, ind: pts[ind])(xyz, idx)        # [B,N,K,3]
    return jnp.concatenate(
        [center, neigh, center - neigh, dist2[..., None]], axis=-1)  # [B,N,K,10]


def local_feature_aggregation(feat, xyz, pp, num_neighbours):
    """feat: [B, d_in, N, 1] (NCHW), xyz: [B, N, 3] -> [B, 2*d_out, N, 1]."""
    B, d_in, N, _ = feat.shape
    K = num_neighbours
    dims = pp["dims"]

    x = jnp.transpose(feat[..., 0], (0, 2, 1)).reshape(B * N, d_in)
    x = _pad_axis(x, 1, dims["d_in_p"])                      # channels-last, lane-padded

    idx, dist2 = knn(xyz, K)
    cxyz = build_concat_xyz(xyz, idx, dist2).reshape(B * N, K, 10)

    # fused shortcut (d_in -> 2*d_out) + mlp_in (d_in -> d_out//2): one read of x
    y = pointwise_mlp(x, *pp["in_fused"])
    residual = y[:, :dims["c2_p"]]                           # [B*N, pad(2*d_out)]
    feat1 = y[:, dims["c2_p"]:]                              # [B*N, pad(d_out//2)]

    att1 = lse_pool(cxyz, feat1, pp["lse1"], pp["att1"], pp["pool1"])  # [B*N, pad(d_out//2)]
    att2 = lse_pool(cxyz, att1, pp["lse2"], pp["att2"], pp["pool2"])   # [B*N, pad(d_out)]

    out = out_residual(att2, residual, *pp["mlp_out"])       # [B*N, pad(2*d_out)]
    out = out[:, :2 * dims["d_out"]].reshape(B, N, 2 * dims["d_out"])
    return jnp.transpose(out, (0, 2, 1))[..., None]          # [B, 2*d_out, N, 1]


# ----------------------------------------------------------------------------
# Pure-JAX reference (same folded, UNpadded parameters) for a sanity check
# ----------------------------------------------------------------------------
def _ref_mlp(x, p):
    w, sc, sh = p
    return jnp.maximum(x @ w * sc + sh, 0.0)


def _ref_lse_pool(cxyz, fc, p_lse, p_att, p_pool):
    lse = _ref_mlp(cxyz, p_lse)
    full = jnp.concatenate(
        [lse, jnp.broadcast_to(fc[:, :, None, :], lse.shape)], axis=-1)
    w_att, b_att = p_att
    scores = jax.nn.softmax(full @ w_att + b_att, axis=2)
    agg = jnp.sum(scores * full, axis=2)
    return _ref_mlp(agg, p_pool)


def reference(feat, xyz, params, num_neighbours):
    B, d_in, N, _ = feat.shape
    K = num_neighbours
    x = jnp.transpose(feat[..., 0], (0, 2, 1))               # [B,N,d_in]
    idx, dist2 = knn(xyz, K)
    cxyz = build_concat_xyz(xyz, idx, dist2)
    residual = _ref_mlp(x, params["shortcut"])
    feat1 = _ref_mlp(x, params["mlp_in"])
    att1 = _ref_lse_pool(cxyz, feat1, params["lse1"], params["att1"], params["pool1"])
    att2 = _ref_lse_pool(cxyz, att1, params["lse2"], params["att2"], params["pool2"])
    y = _ref_mlp(att2, params["mlp_out"]) + residual
    y = jnp.where(y >= 0.0, y, 0.01 * y)
    return jnp.transpose(y, (0, 2, 1))[..., None]


# ----------------------------------------------------------------------------
if __name__ == "__main__":
    B, d_in, N, d_out, K = 2, 4, 16, 8, 8

    key = jax.random.PRNGKey(0)
    k_feat, k_xyz, k_param = jax.random.split(key, 3)
    feat = jax.random.normal(k_feat, (B, d_in, N, 1), jnp.float32)
    xyz = jax.random.normal(k_xyz, (B, N, 3), jnp.float32)
    params = init_params(k_param, d_in, d_out)
    pp = prepare_params(params, d_in, d_out)

    out = local_feature_aggregation(feat, xyz, pp, K)
    out = jax.block_until_ready(out)

    ref = jax.block_until_ready(reference(feat, xyz, params, K))
    assert out.shape == (B, 2 * d_out, N, 1), out.shape
    assert bool(jnp.allclose(out, ref, atol=1e-2, rtol=1e-2)), (
        float(jnp.max(jnp.abs(out - ref))))

    print("KERNEL_OK")
</pallas_src>

<mosaic_0001>
module attributes {stable_mosaic.version = 11 : i64} {
  func.func @_pointwise_mlp_kernel(%arg0: i32, %arg1: memref<32x128xf32, #tpu.memory_space<vmem>>, %arg2: memref<128x256xf32, #tpu.memory_space<vmem>>, %arg3: memref<1x256xf32, #tpu.memory_space<vmem>>, %arg4: memref<1x256xf32, #tpu.memory_space<vmem>>, %arg5: memref<32x256xf32, #tpu.memory_space<vmem>>) attributes {dimension_semantics = [#tpu.dimension_semantics<parallel>], iteration_bounds = array<i64: 1>, scalar_prefetch = 0 : i64, scratch_operands = 0 : i64, tpu.core_type = #tpu.core_type<tc>, window_params = [{transform_indices = @transform_0, window_bounds = array<i64: 32, 128>}, {pipeline_mode = #tpu.pipeline_mode<synchronous>, transform_indices = @transform_1, window_bounds = array<i64: 128, 256>}, {pipeline_mode = #tpu.pipeline_mode<synchronous>, transform_indices = @transform_2, window_bounds = array<i64: 1, 256>}, {pipeline_mode = #tpu.pipeline_mode<synchronous>, transform_indices = @transform_3, window_bounds = array<i64: 1, 256>}, {transform_indices = @transform_4, window_bounds = array<i64: 32, 256>}]} {
    %c0 = arith.constant 0 : index
    %c0_0 = arith.constant 0 : index
    %0 = vector.load %arg1[%c0, %c0_0] : memref<32x128xf32, #tpu.memory_space<vmem>>, vector<32x128xf32>
    %c0_1 = arith.constant 0 : index
    %c0_2 = arith.constant 0 : index
    %1 = vector.load %arg2[%c0_1, %c0_2] : memref<128x256xf32, #tpu.memory_space<vmem>>, vector<128x256xf32>
    %cst = arith.constant dense<0.000000e+00> : vector<32x256xf32>
    %2 = tpu.matmul %0, %1, %cst {dimension_numbers = #tpu.dot_dimension_numbers<[1], [0], [0], [1], [0, 0, 1, 1], [], []>} : vector<32x128xf32>, vector<128x256xf32>, vector<32x256xf32> -> vector<32x256xf32>
    %c0_3 = arith.constant 0 : index
    %c0_4 = arith.constant 0 : index
    %3 = vector.load %arg3[%c0_3, %c0_4] : memref<1x256xf32, #tpu.memory_space<vmem>>, vector<1x256xf32>
    %4 = vector.broadcast %3 : vector<1x256xf32> to vector<32x256xf32>
    %5 = arith.mulf %2, %4 : vector<32x256xf32>
    %c0_5 = arith.constant 0 : index
    %c0_6 = arith.constant 0 : index
    %6 = vector.load %arg4[%c0_5, %c0_6] : memref<1x256xf32, #tpu.memory_space<vmem>>, vector<1x256xf32>
    %7 = vector.broadcast %6 : vector<1x256xf32> to vector<32x256xf32>
    %8 = arith.addf %5, %7 : vector<32x256xf32>
    %cst_7 = arith.constant 0.000000e+00 : f32
    %9 = vector.broadcast %cst_7 : f32 to vector<32x256xf32>
    %10 = arith.maximumf %8, %9 : vector<32x256xf32>
    %c0_8 = arith.constant 0 : index
    %c0_9 = arith.constant 0 : index
    %11 = vector.load %arg5[%c0_8, %c0_9] : memref<32x256xf32, #tpu.memory_space<vmem>>, vector<32x256xf32>
    tpu.vector_store %arg5[%c0_8, %c0_9], %10 {strides = array<i32>} : memref<32x256xf32, #tpu.memory_space<vmem>>, vector<32x256xf32>,
    return
  }
  func.func @transform_0(%arg0: i32) -> (i32, i32) {
    %c0_i32 = arith.constant 0 : i32
    %c0_i32_0 = arith.constant 0 : i32
    return %arg0, %c0_i32 : i32, i32
  }
  func.func @transform_1(%arg0: i32) -> (i32, i32) {
    %c0_i32 = arith.constant 0 : i32
    %c0_i32_0 = arith.constant 0 : i32
    %c0_i32_1 = arith.constant 0 : i32
    return %c0_i32, %c0_i32_0 : i32, i32
  }
  func.func @transform_2(%arg0: i32) -> (i32, i32) {
    %c0_i32 = arith.constant 0 : i32
    %c0_i32_0 = arith.constant 0 : i32
    %c0_i32_1 = arith.constant 0 : i32
    return %c0_i32, %c0_i32_0 : i32, i32
  }
  func.func @transform_3(%arg0: i32) -> (i32, i32) {
    %c0_i32 = arith.constant 0 : i32
    %c0_i32_0 = arith.constant 0 : i32
    %c0_i32_1 = arith.constant 0 : i32
    return %c0_i32, %c0_i32_0 : i32, i32
  }
  func.func @transform_4(%arg0: i32) -> (i32, i32) {
    %c0_i32 = arith.constant 0 : i32
    %c0_i32_0 = arith.constant 0 : i32
    return %arg0, %c0_i32 : i32, i32
  }
}

</mosaic_0001>

<bundles_post_ra>
// kernel: tpu_custom_call.1
= control target key start
LH: loop header
LB: loop body
LE: loop exit
PB: predicated region body
PF: predicated region fallthrough
CT: control target
= control target key end

     0   :  { %9 = vsyncpa [#allocation3], 0  ;;  %s409_s0 = inlined_call_operand.hbm [shape: f32[32,128], index: 0, kind: input, shape index: {}]   ;;  %s410_s1 = inlined_call_operand.hbm [shape: f32[128,256], index: 1, kind: input, shape index: {}]   ;;  %s411_s2 = inlined_call_operand.vmem [shape: f32[1,256], index: 2, kind: input, shape index: {}]   ;;  %s412_s3 = inlined_call_operand.vmem [shape: f32[1,256], index: 3, kind: input, shape index: {}]   ;;  %s413_s4 = inlined_call_operand.hbm [shape: f32[32,256], index: 4, kind: output, shape index: {}]  }
   0x1   :  { %10 = vsyncpa [#allocation6], 0 }
   0x2   :  { %11 = vsyncpa [#allocation4], 0  ;;  %s351_s15 = smov [#allocation2]  }
   0x3   :  { %s17_s16 = sshll.u32 %s351_s15, 4  ;;  %s18_s16 = int_to_ptr.vmem [resolvable:$true] %s17_s16 }
   0x4   :  { %s293_s17 = scalar_lea.vmem %s18_s16, 512  ;;  %p298_p1 = scmp.lt.s32.totalorder %s18_s16, %s18_s16 }
   0x5   :  { %p294_p0 = scmp.ne.s32.totalorder %s18_s16, %s293_s17  ;;  %p299_p2 = scmp.lt.s32.totalorder %s293_s17, %s293_s17 }
   0x7   :  { %p300_p3 = por %p299_p2, %p298_p1 }
   0x9   :  { %p301_p4 = pnand %p300_p3, %p294_p0 }
   0xb   :  { %304 = shalt.err (!%p301_p4)
}
   0xc   :  { %s352_s18 = smov 128   ;;  %s353_s19 = smov 8  }
   0xd   :  { %23 = dma.hbm_to_vmem [thread:$0]  %s409_s0, 512, %s18_s16, [#allocation3], %s352_s18, %s352_s18, %s353_s19  }
   0xe   :  { %s354_s22 = smov [#allocation5]  }
   0xf   :  { %s29_s23 = sshll.u32 %s354_s22, 4  ;;  %s30_s23 = int_to_ptr.vmem [resolvable:$true] %s29_s23 }
  0x10   :  { %s313_s24 = scalar_lea.vmem %s30_s23, 4096  ;;  %p318_p6 = scmp.lt.s32.totalorder %s30_s23, %s30_s23 }
  0x11   :  { %p314_p5 = scmp.ne.s32.totalorder %s30_s23, %s313_s24  ;;  %p319_p7 = scmp.lt.s32.totalorder %s313_s24, %s313_s24 }
  0x13   :  { %p320_p8 = por %p319_p7, %p318_p6 }
  0x15   :  { %p321_p9 = pnand %p320_p8, %p314_p5 }
  0x17   :  { %324 = shalt.err (!%p321_p9)
}
  0x18   :  { %s355_s25 = smov 256   ;;  %s356_s26 = smov 16  }
  0x19   :  { %35 = dma.hbm_to_vmem [thread:$0]  %s410_s1, 4096, %s30_s23, [#allocation6], %s355_s25, %s355_s25, %s356_s26  }
  0x1a   :  { %345 = dma.done.wait [#allocation3], 512  }
  0x1b   :  { %346 = vsyncadd [#allocation3], 4294966784 }
  0x1c   :  { %347 = dma.done.wait [#allocation6], 4096  }
  0x1d   :  { %348 = vsyncadd [#allocation6], 4294963200  ;;  %v357_v0 = vmov 0.0   ;;  %v81_v1 = vld [vmem:[#allocation5 + $0xf8] sm:$0xff]  ;;  %v80_v2 = vld [vmem:[#allocation5 + $0xf0] sm:$0xff]  ;;  %v173_v37 = vlaneseq }
  0x1e   :  { %146 = vmatprep.mubr.f32.mxu0 %v357_v0  ;;  %158 = vmatprep.mubr.f32.mxu1 %v357_v0  ;;  %v79_v3 = vld [vmem:[#allocation5 + $0xe8] sm:$0xff]  ;;  %v78_v4 = vld [vmem:[#allocation5 + $0xe0] sm:$0xff]  ;;  %v77_v5 = vld [vmem:[#allocation5 + $0xd8] sm:$0xff] }
  0x1f   :  { %82 = vmatprep.subr.mxu0 %v81_v1  ;;  %245 = vmatprep.subr.mxu1 %v81_v1  ;;  %v76_v6 = vld [vmem:[#allocation5 + $0xd0] sm:$0xff]  ;;  %v75_v7 = vld [vmem:[#allocation5 + $0xc8] sm:$0xff]  ;;  %v74_v8 = vld [vmem:[#allocation5 + $0xc0] sm:$0xff]  ;;  %v174_v38 = vshrl.u32 %v173_v37, 7 }
  0x20   :  { %83 = vmatpush1.msra.mxu0 %v80_v2  ;;  %261 = vmatpush1.msra.mxu1 %v80_v2  ;;  %v73_v9 = vld [vmem:[#allocation5 + $0xb8] sm:$0xff]  ;;  %v72_v10 = vld [vmem:[#allocation5 + $0xb0] sm:$0xff]  ;;  %v71_v11 = vld [vmem:[#allocation5 + $0xa8] sm:$0xff] }
  0x21   :  { %84 = vmatprep.subr.mxu0 %v79_v3  ;;  %246 = vmatprep.subr.mxu1 %v79_v3  ;;  %v70_v12 = vld [vmem:[#allocation5 + $0xa0] sm:$0xff]  ;;  %v69_v13 = vld [vmem:[#allocation5 + $0x98] sm:$0xff]  ;;  %v68_v14 = vld [vmem:[#allocation5 + $0x90] sm:$0xff]  ;;  %v175_v39 = vsub.s32 0, %v174_v38  ;;  %v179_v41 = vsub.s32 1, %v174_v38 }
  0x22   :  { %85 = vmatpush1.msra.mxu0 %v78_v4  ;;  %262 = vmatpush1.msra.mxu1 %v78_v4  ;;  %v67_v15 = vld [vmem:[#allocation5 + $0x88] sm:$0xff]  ;;  %v66_v16 = vld [vmem:[#allocation5 + $0x80] sm:$0xff]  ;;  %v65_v17 = vld [vmem:[#allocation5 + $0x78] sm:$0xff] }
  0x23   :  { %86 = vmatprep.subr.mxu0 %v77_v5  ;;  %247 = vmatprep.subr.mxu1 %v77_v5  ;;  %v64_v18 = vld [vmem:[#allocation5 + $0x70] sm:$0xff]  ;;  %v63_v19 = vld [vmem:[#allocation5 + $0x68] sm:$0xff]  ;;  %v62_v20 = vld [vmem:[#allocation5 + $0x60] sm:$0xff] }
  0x24   :  { %87 = vmatpush1.msra.mxu0 %v76_v6  ;;  %263 = vmatpush1.msra.mxu1 %v76_v6  ;;  %v61_v21 = vld [vmem:[#allocation5 + $0x58] sm:$0xff]  ;;  %v60_v22 = vld [vmem:[#allocation5 + $0x50] sm:$0xff]  ;;  %v59_v23 = vld [vmem:[#allocation5 + $0x48] sm:$0xff] }
  0x25   :  { %88 = vmatprep.subr.mxu0 %v75_v7  ;;  %248 = vmatprep.subr.mxu1 %v75_v7  ;;  %v58_v24 = vld [vmem:[#allocation5 + $0x40] sm:$0xff]  ;;  %v57_v25 = vld [vmem:[#allocation5 + $0x38] sm:$0xff]  ;;  %v56_v26 = vld [vmem:[#allocation5 + $0x30] sm:$0xff] }
  0x26   :  { %89 = vmatpush1.msra.mxu0 %v74_v8  ;;  %264 = vmatpush1.msra.mxu1 %v74_v8  ;;  %v55_v27 = vld [vmem:[#allocation5 + $0x28] sm:$0xff]  ;;  %v54_v28 = vld [vmem:[#allocation5 + $0x20] sm:$0xff]  ;;  %v53_v29 = vld [vmem:[#allocation5 + $0x18] sm:$0xff] }
  0x27   :  { %90 = vmatprep.subr.mxu0 %v73_v9  ;;  %249 = vmatprep.subr.mxu1 %v73_v9  ;;  %v52_v30 = vld [vmem:[#allocation5 + $0x10] sm:$0xff]  ;;  %v51_v31 = vld [vmem:[#allocation5 + $0x8] sm:$0xff]  ;;  %v50_v32 = vld [vmem:[#allocation5] sm:$0xff] }
  0x28   :  { %91 = vmatpush1.msra.mxu0 %v72_v10  ;;  %265 = vmatpush1.msra.mxu1 %v72_v10  ;;  %v46_v33 = vld [vmem:[#allocation2] sm:$0xff]  ;;  %v48_v34 = vld [vmem:[#allocation2 + $0x10] sm:$0xff]  ;;  %v47_v35 = vld [vmem:[#allocation2 + $0x8] sm:$0xff] }
  0x29   :  { %92 = vmatprep.subr.mxu0 %v71_v11  ;;  %250 = vmatprep.subr.mxu1 %v71_v11  ;;  %v49_v36 = vld [vmem:[#allocation2 + $0x18] sm:$0xff]  ;;  %v171_v40 = vld [vmem:[%s411_s2] sm:$0x3]  ;;  %s358_s2 = smov [#allocation7]  }
  0x2a   :  { %93 = vmatpush1.msra.mxu0 %v70_v12  ;;  %266 = vmatpush1.msra.mxu1 %v70_v12  ;;  %v191_v42 = vld [vmem:[%s412_s3] sm:$0x3]  ;;  %v176_v43 = vrot.slane %v171_v40, %v175_v39  ;;  %v180_v45 = vrot.slane %v171_v40, %v179_v41  ;;  %s232_s3 = sshll.u32 %s358_s2, 4  ;;  %s233_s3 = int_to_ptr.vmem [resolvable:$true] %s232_s3 }
  0x2b   :  { %94 = vmatprep.subr.mxu0 %v69_v13  ;;  %251 = vmatprep.subr.mxu1 %v69_v13  ;;  %v196_v44 = vrot.slane %v191_v42, %v175_v39  ;;  %v200_v50 = vrot.slane %v191_v42, %v179_v41  ;;  %s325_s5 = scalar_lea.vmem %s233_s3, 1024  ;;  %p330_p11 = scmp.lt.s32.totalorder %s233_s3, %s233_s3 }
  0x2c   :  { %95 = vmatpush1.msra.mxu0 %v68_v14  ;;  %267 = vmatpush1.msra.mxu1 %v68_v14  ;;  %p326_p10 = scmp.ne.s32.totalorder %s233_s3, %s325_s5  ;;  %p331_p12 = scmp.lt.s32.totalorder %s325_s5, %s325_s5 }
  0x2d   :  { %96 = vmatprep.subr.mxu0 %v67_v15  ;;  %252 = vmatprep.subr.mxu1 %v67_v15 }
  0x2e   :  { %97 = vmatpush1.msra.mxu0 %v66_v16  ;;  %268 = vmatpush1.msra.mxu1 %v66_v16  ;;  %p332_p13 = por %p331_p12, %p330_p11 }
  0x2f   :  { %98 = vmatprep.subr.mxu0 %v65_v17  ;;  %253 = vmatprep.subr.mxu1 %v65_v17 }
  0x30   :  { %99 = vmatpush1.msra.mxu0 %v64_v18  ;;  %269 = vmatpush1.msra.mxu1 %v64_v18  ;;  %p333_p0 = pnand %p332_p13, %p326_p10 }
  0x31   :  { %100 = vmatprep.subr.mxu0 %v63_v19  ;;  %254 = vmatprep.subr.mxu1 %v63_v19 }
  0x32   :  { %101 = vmatpush1.msra.mxu0 %v62_v20  ;;  %270 = vmatpush1.msra.mxu1 %v62_v20 }
  0x33   :  { %102 = vmatprep.subr.mxu0 %v61_v21  ;;  %255 = vmatprep.subr.mxu1 %v61_v21 }
  0x34   :  { %103 = vmatpush1.msra.mxu0 %v60_v22  ;;  %271 = vmatpush1.msra.mxu1 %v60_v22 }
  0x35   :  { %104 = vmatprep.subr.mxu0 %v59_v23  ;;  %256 = vmatprep.subr.mxu1 %v59_v23 }
  0x36   :  { %105 = vmatpush1.msra.mxu0 %v58_v24  ;;  %272 = vmatpush1.msra.mxu1 %v58_v24 }
  0x37   :  { %106 = vmatprep.subr.mxu0 %v57_v25  ;;  %257 = vmatprep.subr.mxu1 %v57_v25 }
  0x38   :  { %107 = vmatpush1.msra.mxu0 %v56_v26  ;;  %273 = vmatpush1.msra.mxu1 %v56_v26 }
  0x39   :  { %108 = vmatprep.subr.mxu0 %v55_v27  ;;  %258 = vmatprep.subr.mxu1 %v55_v27 }
  0x3a   :  { %109 = vmatpush1.msra.mxu0 %v54_v28  ;;  %274 = vmatpush1.msra.mxu1 %v54_v28 }
  0x3b   :  { %110 = vmatprep.subr.mxu0 %v53_v29  ;;  %259 = vmatprep.subr.mxu1 %v53_v29 }
  0x3c   :  { %111 = vmatpush1.msra.mxu0 %v52_v30  ;;  %275 = vmatpush1.msra.mxu1 %v52_v30 }
  0x3d   :  { %112 = vmatprep.subr.mxu0 %v51_v31  ;;  %260 = vmatprep.subr.mxu1 %v51_v31 }
  0x3e   :  { %113 = vmatpush1.msra.mxu0 %v50_v32  ;;  %276 = vmatpush1.msra.mxu1 %v50_v32 }
  0x3f   :  { %147 = vmatmul.mubr.f32.vlgmr.msra.gmra.mxu0 %v46_v33  ;;  %159 = vmatmul.mubr.f32.vlgmr.msra.gmra.mxu1 %v48_v34 }
  0x40   :  { %152 = vmatprep.mubr.f32.mxu0 %v357_v0  ;;  %164 = vmatprep.mubr.f32.mxu1 %v357_v0 }
  0x43   :  { %153 = vmatmul.mubr.f32.gmra.mxu0 %v47_v35  ;;  %165 = vmatmul.mubr.f32.gmra.mxu1 %v49_v36 }
  0xff   :  { %v148_v46 = vpop.f32.mrf.mxu0  ;;  %v160_v47 = vpop.f32.mrf.mxu1 }
 0x100   :  { %v183_v48 = vmul.f32 %v176_v43, %v148_v46  ;;  %v187_v49 = vmul.f32 %v176_v43, %v160_v47 }
 0x101   :  { %v150_v51 = vpop.f32.mrf.mxu0  ;;  %v162_v52 = vpop.f32.mrf.mxu1 }
 0x102   :  { %v203_v53 = vadd.f32 %v196_v44, %v183_v48  ;;  %v207_v54 = vadd.f32 %v196_v44, %v187_v49  ;;  %v184_v55 = vmul.f32 %v180_v45, %v150_v51  ;;  %v188_v56 = vmul.f32 %v180_v45, %v162_v52 }
 0x103   :  { %v154_v57 = vpop.f32.mrf.mxu0  ;;  %v166_v58 = vpop.f32.mrf.mxu1 }
 0x104   :  { %v211_v59 = vmax.f32 %v203_v53, 0.0  ;;  %v215_v60 = vmax.f32 %v207_v54, 0.0  ;;  %v204_v61 = vadd.f32 %v200_v50, %v184_v55  ;;  %v208_v62 = vadd.f32 %v200_v50, %v188_v56 }
 0x105   :  { %v185_v63 = vmul.f32 %v176_v43, %v154_v57  ;;  %v189_v0 = vmul.f32 %v176_v43, %v166_v58  ;;  %v156_v1 = vpop.f32.mrf.mxu0  ;;  %v168_v2 = vpop.f32.mrf.mxu1 }
 0x106   :  { %219 = vst [vmem:[#allocation7] sm:$0xff] %v211_v59  ;;  %223 = vst [vmem:[#allocation7 + $0x20] sm:$0xff] %v215_v60  ;;  %v212_v3 = vmax.f32 %v204_v61, 0.0  ;;  %v216_v4 = vmax.f32 %v208_v62, 0.0  ;;  %v186_v5 = vmul.f32 %v180_v45, %v156_v1  ;;  %v190_v6 = vmul.f32 %v180_v45, %v168_v2 }
 0x107   :  { %v205_v7 = vadd.f32 %v196_v44, %v185_v63  ;;  %v209_v8 = vadd.f32 %v196_v44, %v189_v0 }
 0x108   :  { %220 = vst [vmem:[#allocation7 + $0x8] sm:$0xff] %v212_v3  ;;  %224 = vst [vmem:[#allocation7 + $0x28] sm:$0xff] %v216_v4  ;;  %v206_v9 = vadd.f32 %v200_v50, %v186_v5  ;;  %v210_v10 = vadd.f32 %v200_v50, %v190_v6 }
 0x109   :  { %v213_v11 = vmax.f32 %v205_v7, 0.0  ;;  %v217_v12 = vmax.f32 %v209_v8, 0.0 }
 0x10a   :  { %v214_v13 = vmax.f32 %v206_v9, 0.0  ;;  %v218_v14 = vmax.f32 %v210_v10, 0.0 }
 0x10b   :  { %221 = vst [vmem:[#allocation7 + $0x10] sm:$0xff] %v213_v11  ;;  %225 = vst [vmem:[#allocation7 + $0x30] sm:$0xff] %v217_v12 }
 0x10c   :  { %222 = vst [vmem:[#allocation7 + $0x18] sm:$0xff] %v214_v13  ;;  %226 = vst [vmem:[#allocation7 + $0x38] sm:$0xff] %v218_v14 }
 0x10d   :  { %336 = shalt.err (!%p333_p0)
}
 0x10e   :  { %238 = dma.vmem_to_hbm [thread:$0]  %s233_s3, 1024, %s413_s4, [#allocation4], %s355_s25, %s355_s25, %s356_s26  }
 0x10f   :  { %349 = dma.done.wait [#allocation4], 1024  }
 0x110   :  { %350 = vsyncadd [#allocation4], 4294966272 }
 0x111   :  { %242 = vsyncpa [#allocation3], 1 }
 0x112   :  { %243 = vsyncpa [#allocation6], 1 }
 0x113   :  { %244 = vsyncpa [#allocation4], 1 }

</bundles_post_ra>
